<compile_context>
chip_gen: v7x
topology: tpu7x:2x2x1
jax: 0.10.0
libtpu: 0.0.40
codegen_flags: <defaults>
</compile_context>

<pallas_src>
import jax
import jax.numpy as jnp
from jax.experimental import pallas as pl
from jax.experimental.pallas import tpu as pltpu


def _triple_tanh_dup4_kernel(x_ref, o_ref):
    # x_ref: (B, C*D) f32, o_ref: (B, 4*C*D) f32.
    cd = x_ref.shape[1]
    # Three chained elementwise tanh applications (EUP).
    t = jnp.tanh(jnp.tanh(jnp.tanh(x_ref[...])))
    # Duplicate 4x along the lane axis via static-offset stores (cd is a
    # compile-time constant, so these are static slices -> plain vst.msk).
    o_ref[:, 0 * cd:1 * cd] = t
    o_ref[:, 1 * cd:2 * cd] = t
    o_ref[:, 2 * cd:3 * cd] = t
    o_ref[:, 3 * cd:4 * cd] = t


def model_forward(x):
    """x: (B, C, D) float32 -> (B, 4*C*D) float32."""
    # TODO(synk): torch.cat((x, np.zeros([239, 3])), dim=1) in the reference
    # module raises in PyTorch (numpy arg / mismatched dims); it is omitted.
    B, C, D = x.shape
    cd = C * D
    # Free row-major view: (B, C, D) -> (B, C*D); the kernel emits the final
    # flattened (B, 4*C*D) shape directly.
    x2d = x.reshape(B, cd)
    return pl.pallas_call(
        _triple_tanh_dup4_kernel,
        out_shape=jax.ShapeDtypeStruct((B, 4 * cd), x.dtype),
        in_specs=[pl.BlockSpec(memory_space=pltpu.MemorySpace.VMEM)],
        out_specs=pl.BlockSpec(memory_space=pltpu.MemorySpace.VMEM),
    )(x2d)


def _reference(x):
    # Pure-JAX reference mirroring the PyTorch module (minus the erroring cat).
    y = jnp.concatenate([x, x], axis=1)
    y = jnp.tanh(y)
    y = jnp.tanh(y.reshape(y.shape[0], y.shape[1], -1))
    y = jnp.concatenate([y, y], axis=1)
    return jnp.tanh(y.reshape(y.shape[0], -1))


if __name__ == "__main__":
    key = jax.random.PRNGKey(0)
    x = jax.random.normal(key, (2, 3, 4), dtype=jnp.float32)

    out = model_forward(x)
    out = jax.block_until_ready(out)

    assert out.shape == (2, 48), out.shape
    ref = _reference(x)
    assert jnp.allclose(out, ref, atol=1e-6, rtol=1e-6)

    print("KERNEL_OK")
</pallas_src>

<mosaic_0001>
module attributes {stable_mosaic.version = 11 : i64} {
  func.func @_triple_tanh_dup4_kernel(%arg0: memref<2x12xf32, #tpu.memory_space<vmem>>, %arg1: memref<2x48xf32, #tpu.memory_space<vmem>>) attributes {dimension_semantics = [], scalar_prefetch = 0 : i64, scratch_operands = 0 : i64, tpu.core_type = #tpu.core_type<tc>} {
    %c0 = arith.constant 0 : index
    %c0_0 = arith.constant 0 : index
    %0 = vector.load %arg0[%c0, %c0_0] : memref<2x12xf32, #tpu.memory_space<vmem>>, vector<2x12xf32>
    %1 = math.tanh %0 : vector<2x12xf32>
    %2 = math.tanh %1 : vector<2x12xf32>
    %3 = math.tanh %2 : vector<2x12xf32>
    %c0_1 = arith.constant 0 : index
    %c0_2 = arith.constant 0 : index
    %4 = vector.load %arg1[%c0_1, %c0_2] : memref<2x48xf32, #tpu.memory_space<vmem>>, vector<2x12xf32>
    tpu.vector_store %arg1[%c0_1, %c0_2], %3 {strides = array<i32>} : memref<2x48xf32, #tpu.memory_space<vmem>>, vector<2x12xf32>,
    %c0_3 = arith.constant 0 : index
    %c12 = arith.constant 12 : index
    %5 = vector.load %arg1[%c0_3, %c12] : memref<2x48xf32, #tpu.memory_space<vmem>>, vector<2x12xf32>
    tpu.vector_store %arg1[%c0_3, %c12], %3 {strides = array<i32>} : memref<2x48xf32, #tpu.memory_space<vmem>>, vector<2x12xf32>,
    %c0_4 = arith.constant 0 : index
    %c24 = arith.constant 24 : index
    %6 = vector.load %arg1[%c0_4, %c24] : memref<2x48xf32, #tpu.memory_space<vmem>>, vector<2x12xf32>
    tpu.vector_store %arg1[%c0_4, %c24], %3 {strides = array<i32>} : memref<2x48xf32, #tpu.memory_space<vmem>>, vector<2x12xf32>,
    %c0_5 = arith.constant 0 : index
    %c36 = arith.constant 36 : index
    %7 = vector.load %arg1[%c0_5, %c36] : memref<2x48xf32, #tpu.memory_space<vmem>>, vector<2x12xf32>
    tpu.vector_store %arg1[%c0_5, %c36], %3 {strides = array<i32>} : memref<2x48xf32, #tpu.memory_space<vmem>>, vector<2x12xf32>,
    return
  }
}

</mosaic_0001>

<bundles_post_ra>
// kernel: tpu_custom_call.1
= control target key start
LH: loop header
LB: loop body
LE: loop exit
PB: predicated region body
PF: predicated region fallthrough
CT: control target
= control target key end

     0   :  { %6 = vsyncpa [#allocation3], 0  ;;  %s156_s0 = inlined_call_operand.hbm [shape: f32[2,12], index: 0, kind: input, shape index: {}]   ;;  %s157_s1 = inlined_call_operand.hbm [shape: f32[2,48], index: 1, kind: output, shape index: {}]  }
   0x1   :  { %7 = vsyncpa [#allocation4], 0  ;;  %s117_s6 = smov [#allocation2]   ;;  %s69_s10 = scalar_lea.hbm %s156_s0, 32 }
   0x2   :  { %s14_s7 = sshll.u32 %s117_s6, 4  ;;  %p70_p0 = scmp.ne.s32.totalorder %s156_s0, %s69_s10  ;;  %s15_s7 = int_to_ptr.vmem [resolvable:$true] %s14_s7 }
   0x3   :  { %p73_p1 = scmp.lt.u32.totalorder %s69_s10, %s156_s0 }
   0x5   :  { %p75_p2 = pnand %p73_p1, %p70_p0 }
   0x7   :  { %78 = shalt.err (!%p75_p2)
}
   0x8   :  { %s79_s15 = scalar_lea.vmem %s15_s7, 32  ;;  %p84_p4 = scmp.lt.s32.totalorder %s15_s7, %s15_s7 }
   0x9   :  { %p80_p3 = scmp.ne.s32.totalorder %s15_s7, %s79_s15  ;;  %p85_p5 = scmp.lt.s32.totalorder %s79_s15, %s79_s15 }
   0xb   :  { %p86_p6 = por %p85_p5, %p84_p4 }
   0xd   :  { %p87_p7 = pnand %p86_p6, %p80_p3 }
   0xf   :  { %90 = shalt.err (!%p87_p7)
}
  0x10   :  { %17 = dma.hbm_to_vmem [thread:$0]  %s156_s0, 32, %s15_s7, [#allocation3]  }
  0x11   :  { %113 = dma.done.wait [#allocation3], 32  }
  0x12   :  { %114 = vsyncadd [#allocation3], 4294967264  ;;  %v21_v0 = vld [vmem:[#allocation2] sm:$0x3]  ;;  %vm25_vm0 = vcmask 91136   ;;  %s118_s18 = smov 12  }
  0x13   :  { %63 = vtanh.f32 %v21_v0  ;;  %s119_s19 = smov 36   ;;  %s120_s20 = smov 24   ;;  %vm31_vm1 = vcmask 189536   ;;  %vm36_vm2 = vcmask 287936   ;;  %vm41_vm3 = vcmask 386336  }
  0x14   :  { %s121_s0 = smov [#allocation5]  }
  0x15   :  { %s49_s21 = sshll.u32 %s121_s0, 4  ;;  %s50_s21 = int_to_ptr.vmem [resolvable:$true] %s49_s21 }
  0x16   :  { %s91_s22 = scalar_lea.vmem %s50_s21, 32  ;;  %p96_p9 = scmp.lt.s32.totalorder %s50_s21, %s50_s21 }
  0x17   :  { %p92_p8 = scmp.ne.s32.totalorder %s50_s21, %s91_s22  ;;  %p97_p10 = scmp.lt.s32.totalorder %s91_s22, %s91_s22 }
  0x19   :  { %p98_p11 = por %p97_p10, %p96_p9 }
  0x1b   :  { %p99_p12 = pnand %p98_p11, %p92_p8 }
  0x1d   :  { %v64_v1 = vpop.eup %63 }
  0x1e   :  { %65 = vtanh.f32 %v64_v1 }
  0x28   :  { %v66_v2 = vpop.eup %65 }
  0x29   :  { %67 = vtanh.f32 %v66_v2 }
  0x33   :  { %v68_v3 = vpop.eup %67 }
  0x34   :  { %28 = vrot.lane.b32.xlu0 %v68_v3, %s118_s18  ;;  %38 = vrot.lane.b32.xlu1 %v68_v3, %s119_s19  ;;  %26 = vst.msk [vmem:[#allocation5] sm:$0x3] %vm25_vm0, %v68_v3 }
  0x38   :  { %33 = vrot.lane.b32.xlu0 %v68_v3, %s120_s20 }
  0xa6   :  { %v29_v4 = vpop.permute.xlu0 %28  ;;  %v39_v5 = vpop.permute.xlu1 %38 }
  0xa7   :  { %32 = vst.msk [vmem:[#allocation5] sm:$0x3] %vm31_vm1, %v29_v4 }
  0xaa   :  { %v34_v6 = vpop.permute.xlu0 %33 }
  0xab   :  { %37 = vst.msk [vmem:[#allocation5] sm:$0x3] %vm36_vm2, %v34_v6 }
  0xac   :  { %42 = vst.msk [vmem:[#allocation5] sm:$0x3] %vm41_vm3, %v39_v5 }
  0xad   :  { %102 = shalt.err (!%p99_p12)
}
  0xae   :  { %s103_s25 = scalar_lea.hbm %s157_s1, 32 }
  0xaf   :  { %p104_p13 = scmp.ne.s32.totalorder %s157_s1, %s103_s25  ;;  %p107_p0 = scmp.lt.u32.totalorder %s103_s25, %s157_s1 }
  0xb1   :  { %p109_p1 = pnand %p107_p0, %p104_p13 }
  0xb3   :  { %112 = shalt.err (!%p109_p1)
}
  0xb4   :  { %52 = dma.vmem_to_hbm [thread:$0]  %s50_s21, 32, %s157_s1, [#allocation4]  }
  0xb5   :  { %115 = dma.done.wait [#allocation4], 32  }
  0xb6   :  { %116 = vsyncadd [#allocation4], 4294967264 }
  0xb7   :  { %56 = vsyncpa [#allocation3], 1 }
  0xb8   :  { %57 = vsyncpa [#allocation4], 1 }

</bundles_post_ra>
